<compile_context>
chip_gen: v6e
topology: v6e:2x2x1
jax: 0.10.0
libtpu: 0.0.40
codegen_flags: <defaults>
</compile_context>

<pallas_src>
import functools

import numpy as np
import jax
import jax.numpy as jnp
from jax import lax
from jax.experimental import pallas as pl
from jax.experimental.pallas import tpu as pltpu


def _softplus(x):
    # numerically stable softplus (beta=1), matches torch.nn.Softplus()
    return jnp.maximum(x, 0.0) + jnp.log(1.0 + jnp.exp(-jnp.abs(x)))


def lstmnet_kernel(obs_ref, w_ref, state0_ref, heat_ref, state_ref, *,
                   hid, feat_aug, out_dim, bias, heat_map):
    # obs_ref    : (T, Bt, Fa)  bf16; lanes [0:F)=features, lane F = 1.0
    #                            (gate-bias lane), remaining lanes = 0
    # w_ref      : (Wr, Wc)     bf16 packed weights (see header comment);
    #                            gate column order is i, f, o, g
    # state0_ref : (Bt, 2H)     f32 [h0 | c0]
    # heat_ref   : (T, Bt, O)   f32 normalized heat-map rows
    # state_ref  : (Bt, 2H)     f32 [hn | cn]  (HBM-aliased with state0)
    T = obs_ref.shape[0]
    H = hid
    Fa = feat_aug
    O = out_dim

    # static, 16-row-aligned slices of the packed weight (loop invariant)
    wx = w_ref[0:Fa, 0:4 * H]                       # (Fa, 4H) bf16, bias folded
    wh = w_ref[Fa:Fa + H, 0:4 * H]                  # (H, 4H)  bf16
    wpost = w_ref[Fa + H:Fa + 2 * H, 0:O]           # (H, O)   bf16
    bpost = w_ref[Fa + 2 * H:Fa + 2 * H + 1, 0:O].astype(jnp.float32)  # (1, O)

    def step(t, carry):
        h, c = carry                                # (Bt, H) f32 each
        x = obs_ref[t]                              # (Bt, Fa) bf16
        # two MXU pushes, shared f32 accumulation; no lane concat, no bias add
        gates = (jnp.dot(x, wx, preferred_element_type=jnp.float32) +
                 jnp.dot(h.astype(jnp.bfloat16), wh,
                         preferred_element_type=jnp.float32))   # (Bt, 4H) f32

        # gate columns pre-ordered (i, f, o, g): one sigmoid slab + one tanh
        sig = jax.nn.sigmoid(gates[:, 0:3 * H])
        g_g = jnp.tanh(gates[:, 3 * H:4 * H])
        i_g = sig[:, 0:H]
        f_g = sig[:, H:2 * H]
        o_g = sig[:, 2 * H:3 * H]

        c_new = f_g * c + i_g * g_g                 # f32 recurrence
        h_new = o_g * jnp.tanh(c_new)

        # post layer + Softplus (+ heat-map normalization), lane-dense output
        y = jnp.dot(h_new.astype(jnp.bfloat16), wpost,
                    preferred_element_type=jnp.float32) + bpost
        y = _softplus(y)
        if heat_map:
            y = y + bias
            # sum over (-1, -2) of the (mh, mw) map == sum over the whole O
            # axis per (b, t) row (exact because map_dim is 2-D and T == 1)
            y = y * pl.reciprocal(jnp.sum(y, axis=-1, keepdims=True),
                                  approx=False)
        heat_ref[t] = y
        return h_new, c_new

    h0 = state0_ref[:, 0:H]
    c0 = state0_ref[:, H:2 * H]
    # full unroll only for short sequences; cap at 8 to bound code size /
    # vreg pressure for long T
    unroll = True if T <= 8 else 8
    hn, cn = lax.fori_loop(0, T, step, (h0, c0), unroll=unroll)
    state_ref[:, 0:H] = hn
    state_ref[:, H:2 * H] = cn


def prepare_params(params):
    """One-time packing of LSTMNet parameters into a single bf16 kernel weight
    (hoisted out of the per-call path)."""
    w_ih, w_hh = params["w_ih"], params["w_hh"]          # (4H, F), (4H, H)
    b_ih, b_hh = params["b_ih"], params["b_hh"]          # (4H,), (4H,)
    w_post, b_post = params["w_post"], params["b_post"]  # (O, H), (O,)

    H = w_hh.shape[1]
    F = w_ih.shape[1]
    O = w_post.shape[0]
    Fa = ((F + 1 + 15) // 16) * 16                       # features + ones lane
    Wc = max(4 * H, ((O + 127) // 128) * 128)            # packed lane width

    def reorder(m):   # gate columns [i f g o] -> [i f o g]
        return jnp.concatenate(
            [m[:, :2 * H], m[:, 3 * H:4 * H], m[:, 2 * H:3 * H]], axis=1)

    wx = jnp.transpose(w_ih).astype(jnp.float32)          # (F, 4H)
    bias_row = (b_ih + b_hh).reshape(1, 4 * H).astype(jnp.float32)
    wx_aug = jnp.concatenate(
        [wx, bias_row, jnp.zeros((Fa - F - 1, 4 * H), jnp.float32)], axis=0)
    wx_aug = reorder(wx_aug)                              # (Fa, 4H)
    wh = reorder(jnp.transpose(w_hh).astype(jnp.float32)) # (H, 4H)
    wpost = jnp.transpose(w_post).astype(jnp.float32)     # (H, O)
    bpost_row = b_post.reshape(1, O).astype(jnp.float32)  # (1, O)

    def pad_cols(m):
        return jnp.pad(m, ((0, 0), (0, Wc - m.shape[1])))

    w_packed = jnp.concatenate(
        [pad_cols(wx_aug), pad_cols(wh), pad_cols(wpost), pad_cols(bpost_row)],
        axis=0)                                           # (Fa + 2H + 1, Wc)
    Wr = ((w_packed.shape[0] + 15) // 16) * 16
    w_packed = jnp.pad(w_packed, ((0, Wr - w_packed.shape[0]), (0, 0)))

    return {"w_packed": w_packed.astype(jnp.bfloat16)}    # (Wr, Wc) bf16


@functools.partial(jax.jit, static_argnames=("map_dim", "bias", "heat_map"))
def lstmnet_forward(packed, obs, hidden, *, map_dim, bias=0.1, heat_map=True):
    """Pallas implementation of LSTMNet.forward(obs, hidden)."""
    w_packed = packed["w_packed"]
    B, T, F = obs.shape
    O = int(np.prod(map_dim))
    h0, c0 = hidden
    H = h0.shape[-1]
    Fa = ((F + 1 + 15) // 16) * 16
    Wr, Wc = w_packed.shape
    assert 4 * H <= Wc and O <= Wc
    assert Wr >= Fa + 2 * H + 1

    state0 = jnp.concatenate([h0[0], c0[0]], axis=-1).astype(jnp.float32)  # (B, 2H)

    # time-major obs, trailing ones lane (folds the gate bias), zero pad to the
    # bf16 sublane tile; tiny per-call ops, off the kernel critical path.
    obs_t = jnp.transpose(obs, (1, 0, 2)).astype(jnp.float32)      # (T, B, F)
    obs_aug = jnp.concatenate([obs_t, jnp.ones((T, B, 1), jnp.float32)], axis=-1)
    if Fa > F + 1:
        obs_aug = jnp.pad(obs_aug, ((0, 0), (0, 0), (0, Fa - F - 1)))
    obs_aug = obs_aug.astype(jnp.bfloat16)

    # batch tiling: one grid step per batch tile; "parallel" lets v7x's two
    # TensorCores split tiles (grid stays (1,) at small B).
    Bt = B
    for cand in (256, 128):
        if B % cand == 0:
            Bt = cand
            break
    grid = (B // Bt,)

    kernel = functools.partial(lstmnet_kernel, hid=H, feat_aug=Fa, out_dim=O,
                               bias=float(bias), heat_map=bool(heat_map))

    heat, state = pl.pallas_call(
        kernel,
        grid=grid,
        in_specs=[
            pl.BlockSpec((T, Bt, Fa), lambda b: (0, b, 0)),
            pl.BlockSpec((Wr, Wc), lambda b: (0, 0)),
            pl.BlockSpec((Bt, 2 * H), lambda b: (b, 0)),
        ],
        out_specs=(
            pl.BlockSpec((T, Bt, O), lambda b: (0, b, 0)),
            pl.BlockSpec((Bt, 2 * H), lambda b: (b, 0)),
        ),
        out_shape=(
            jax.ShapeDtypeStruct((T, B, O), jnp.float32),
            jax.ShapeDtypeStruct((B, 2 * H), jnp.float32),
        ),
        input_output_aliases={2: 1},   # state0 HBM buffer reused for [hn | cn]
        compiler_params=pltpu.CompilerParams(
            dimension_semantics=("parallel",)),
    )(obs_aug, w_packed, state0)

    # (T, B, O) -> (B, T, O) -> (B, *map_dim)  (requires T == 1, like PyTorch)
    out = jnp.transpose(heat, (1, 0, 2)).reshape((B,) + tuple(map_dim))
    hn = state[:, :H][None]
    cn = state[:, H:][None]
    return out, (hn, cn)


def ref_forward(params, obs, hidden, map_dim, bias=0.1):
    """Pure-JAX f32 reference mirroring the PyTorch forward (heat_map=True)."""
    w_ih, w_hh = params["w_ih"], params["w_hh"]
    b_ih, b_hh = params["b_ih"], params["b_hh"]
    w_post, b_post = params["w_post"], params["b_post"]
    B, T, F = obs.shape
    H = w_hh.shape[1]
    h, c = hidden[0][0], hidden[1][0]
    outs = []
    for t in range(T):
        x = obs[:, t, :]
        gates = x @ w_ih.T + h @ w_hh.T + b_ih + b_hh
        i = jax.nn.sigmoid(gates[:, :H])
        f = jax.nn.sigmoid(gates[:, H:2 * H])
        g = jnp.tanh(gates[:, 2 * H:3 * H])
        o = jax.nn.sigmoid(gates[:, 3 * H:])
        c = f * c + i * g
        h = o * jnp.tanh(c)
        outs.append(h)
    seq = jnp.stack(outs, axis=1)                         # (B, T, H)
    y = jax.nn.softplus(seq @ w_post.T + b_post)
    y = y.reshape((B,) + tuple(map_dim))
    y = y + bias
    y = y / jnp.sum(y, axis=(-1, -2), keepdims=True)
    return y, (h[None], c[None])


if __name__ == "__main__":
    key = jax.random.PRNGKey(0)

    feature_dim = 8
    map_dim = (16, 16)
    B, T = 2, 1          # time_len must be 1 for the reshape in forward()
    H = 64               # lstm hidden size (fixed in the module)
    O = int(np.prod(map_dim))

    ks = jax.random.split(key, 8)
    scale = 1.0 / np.sqrt(H)
    # pre_layer (nn.Linear(feature_dim, 20)) is defined in __init__ but never
    # used in forward(); omitted.
    params = {
        "w_ih": jax.random.uniform(ks[0], (4 * H, feature_dim), jnp.float32, -scale, scale),
        "w_hh": jax.random.uniform(ks[1], (4 * H, H), jnp.float32, -scale, scale),
        "b_ih": jax.random.uniform(ks[2], (4 * H,), jnp.float32, -scale, scale),
        "b_hh": jax.random.uniform(ks[3], (4 * H,), jnp.float32, -scale, scale),
        "w_post": jax.random.uniform(ks[4], (O, H), jnp.float32, -scale, scale),
        "b_post": jax.random.uniform(ks[5], (O,), jnp.float32, -scale, scale),
    }

    obs = jax.random.normal(ks[6], (B, T, feature_dim), jnp.float32)
    # hiddenInitialize(bsize=B)
    h0 = jnp.zeros((1, B, H), jnp.float32)
    c0 = jnp.zeros((1, B, H), jnp.float32)

    packed = prepare_params(params)   # one-time packing (outside per-call path)
    out, (hn, cn) = lstmnet_forward(packed, obs, (h0, c0), map_dim=map_dim)
    jax.block_until_ready(out)
    jax.block_until_ready(hn)
    jax.block_until_ready(cn)

    ref_out, (ref_hn, ref_cn) = ref_forward(params, obs, (h0, c0), map_dim)

    assert out.shape == (B,) + map_dim
    assert hn.shape == (1, B, H) and cn.shape == (1, B, H)
    # tolerances cover bf16 matmul operands (weights + folded biases)
    assert np.allclose(np.asarray(out), np.asarray(ref_out), rtol=3e-3, atol=3e-3)
    assert np.allclose(np.asarray(hn), np.asarray(ref_hn), rtol=3e-3, atol=3e-3)
    assert np.allclose(np.asarray(cn), np.asarray(ref_cn), rtol=3e-3, atol=3e-3)

    print("KERNEL_OK")
</pallas_src>

<mosaic_0001>
module attributes {stable_mosaic.version = 11 : i64} {
  func.func @lstmnet_kernel(%arg0: i32, %arg1: memref<1x2x16xbf16, #tpu.memory_space<vmem>>, %arg2: memref<160x256xbf16, #tpu.memory_space<vmem>>, %arg3: memref<2x128xf32, #tpu.memory_space<vmem>>, %arg4: memref<1x2x256xf32, #tpu.memory_space<vmem>>, %arg5: memref<2x128xf32, #tpu.memory_space<vmem>>) attributes {dimension_semantics = [#tpu.dimension_semantics<parallel>], iteration_bounds = array<i64: 1>, scalar_prefetch = 0 : i64, scratch_operands = 0 : i64, tpu.core_type = #tpu.core_type<tc>, window_params = [{transform_indices = @transform_0, window_bounds = array<i64: 1, 2, 16>}, {pipeline_mode = #tpu.pipeline_mode<synchronous>, transform_indices = @transform_1, window_bounds = array<i64: 160, 256>}, {transform_indices = @transform_2, window_bounds = array<i64: 2, 128>}, {transform_indices = @transform_3, window_bounds = array<i64: 1, 2, 256>}, {transform_indices = @transform_4, window_bounds = array<i64: 2, 128>}]} {
    %c0 = arith.constant 0 : index
    %c0_0 = arith.constant 0 : index
    %0 = vector.load %arg2[%c0, %c0_0] : memref<160x256xbf16, #tpu.memory_space<vmem>>, vector<16x256xbf16>
    %c16 = arith.constant 16 : index
    %c0_1 = arith.constant 0 : index
    %1 = vector.load %arg2[%c16, %c0_1] : memref<160x256xbf16, #tpu.memory_space<vmem>>, vector<64x256xbf16>
    %c80 = arith.constant 80 : index
    %c0_2 = arith.constant 0 : index
    %2 = vector.load %arg2[%c80, %c0_2] : memref<160x256xbf16, #tpu.memory_space<vmem>>, vector<64x256xbf16>
    %c144 = arith.constant 144 : index
    %c0_3 = arith.constant 0 : index
    %3 = vector.load %arg2[%c144, %c0_3] : memref<160x256xbf16, #tpu.memory_space<vmem>>, vector<1x256xbf16>
    %4 = arith.extf %3 : vector<1x256xbf16> to vector<1x256xf32>
    %c0_4 = arith.constant 0 : index
    %c0_5 = arith.constant 0 : index
    %5 = vector.load %arg3[%c0_4, %c0_5] : memref<2x128xf32, #tpu.memory_space<vmem>>, vector<2x64xf32>
    %c0_6 = arith.constant 0 : index
    %c64 = arith.constant 64 : index
    %6 = vector.load %arg3[%c0_6, %c64] : memref<2x128xf32, #tpu.memory_space<vmem>>, vector<2x64xf32>
    %c0_i32 = arith.constant 0 : i32
    %7 = arith.index_cast %c0_i32 : i32 to index
    %c0_7 = arith.constant 0 : index
    %c0_8 = arith.constant 0 : index
    %8 = vector.load %arg1[%7, %c0_7, %c0_8] : memref<1x2x16xbf16, #tpu.memory_space<vmem>>, vector<1x2x16xbf16>
    %9 = vector.shape_cast %8 : vector<1x2x16xbf16> to vector<2x16xbf16>
    %cst = arith.constant dense<0.000000e+00> : vector<2x256xf32>
    %10 = tpu.matmul %9, %0, %cst {dimension_numbers = #tpu.dot_dimension_numbers<[1], [0], [0], [1], [0, 0, 1, 1], [], []>} : vector<2x16xbf16>, vector<16x256xbf16>, vector<2x256xf32> -> vector<2x256xf32>
    %11 = arith.truncf %5 : vector<2x64xf32> to vector<2x64xbf16>
    %cst_9 = arith.constant dense<0.000000e+00> : vector<2x256xf32>
    %12 = tpu.matmul %11, %1, %cst_9 {dimension_numbers = #tpu.dot_dimension_numbers<[1], [0], [0], [1], [0, 0, 1, 1], [], []>} : vector<2x64xbf16>, vector<64x256xbf16>, vector<2x256xf32> -> vector<2x256xf32>
    %13 = arith.addf %10, %12 : vector<2x256xf32>
    %14 = vector.extract_strided_slice %13 {offsets = [0, 0], sizes = [2, 192], strides = [1, 1]} : vector<2x256xf32> to vector<2x192xf32>
    %15 = arith.negf %14 : vector<2x192xf32>
    %16 = math.exp %15 : vector<2x192xf32>
    %cst_10 = arith.constant 1.000000e+00 : f32
    %17 = vector.broadcast %cst_10 : f32 to vector<2x192xf32>
    %18 = arith.addf %17, %16 : vector<2x192xf32>
    %19 = arith.divf %17, %18 : vector<2x192xf32>
    %20 = vector.extract_strided_slice %13 {offsets = [0, 192], sizes = [2, 64], strides = [1, 1]} : vector<2x256xf32> to vector<2x64xf32>
    %21 = math.tanh %20 : vector<2x64xf32>
    %22 = vector.extract_strided_slice %19 {offsets = [0, 0], sizes = [2, 64], strides = [1, 1]} : vector<2x192xf32> to vector<2x64xf32>
    %23 = vector.extract_strided_slice %19 {offsets = [0, 64], sizes = [2, 64], strides = [1, 1]} : vector<2x192xf32> to vector<2x64xf32>
    %24 = vector.extract_strided_slice %19 {offsets = [0, 128], sizes = [2, 64], strides = [1, 1]} : vector<2x192xf32> to vector<2x64xf32>
    %25 = arith.mulf %23, %6 : vector<2x64xf32>
    %26 = arith.mulf %22, %21 : vector<2x64xf32>
    %27 = arith.addf %25, %26 : vector<2x64xf32>
    %28 = math.tanh %27 : vector<2x64xf32>
    %29 = arith.mulf %24, %28 : vector<2x64xf32>
    %30 = arith.truncf %29 : vector<2x64xf32> to vector<2x64xbf16>
    %cst_11 = arith.constant dense<0.000000e+00> : vector<2x256xf32>
    %31 = tpu.matmul %30, %2, %cst_11 {dimension_numbers = #tpu.dot_dimension_numbers<[1], [0], [0], [1], [0, 0, 1, 1], [], []>} : vector<2x64xbf16>, vector<64x256xbf16>, vector<2x256xf32> -> vector<2x256xf32>
    %32 = vector.broadcast %4 : vector<1x256xf32> to vector<2x256xf32>
    %33 = arith.addf %31, %32 : vector<2x256xf32>
    %cst_12 = arith.constant 0.000000e+00 : f32
    %34 = vector.broadcast %cst_12 : f32 to vector<2x256xf32>
    %35 = arith.maximumf %33, %34 : vector<2x256xf32>
    %36 = math.absf %33 : vector<2x256xf32>
    %cst_13 = arith.constant 0.000000e+00 : f32
    %37 = vector.broadcast %cst_13 : f32 to vector<2x256xf32>
    %38 = arith.subf %37, %36 : vector<2x256xf32>
    %39 = math.exp %38 : vector<2x256xf32>
    %cst_14 = arith.constant 1.000000e+00 : f32
    %40 = vector.broadcast %cst_14 : f32 to vector<2x256xf32>
    %41 = arith.addf %40, %39 : vector<2x256xf32>
    %42 = math.log %41 : vector<2x256xf32>
    %43 = arith.addf %35, %42 : vector<2x256xf32>
    %cst_15 = arith.constant 1.000000e-01 : f32
    %44 = vector.broadcast %cst_15 : f32 to vector<2x256xf32>
    %45 = arith.addf %43, %44 : vector<2x256xf32>
    %cst_16 = arith.constant dense<0.000000e+00> : vector<2xf32>
    %46 = vector.multi_reduction <add>, %45, %cst_16 [1] : vector<2x256xf32> to vector<2xf32>
    %47 = vector.shape_cast %46 : vector<2xf32> to vector<2x1xf32>
    %48 = tpu.reciprocal %47 : vector<2x1xf32> -> vector<2x1xf32>
    %49 = vector.broadcast %48 : vector<2x1xf32> to vector<2x256xf32>
    %50 = arith.mulf %45, %49 : vector<2x256xf32>
    %51 = arith.index_cast %c0_i32 : i32 to index
    %c0_17 = arith.constant 0 : index
    %c0_18 = arith.constant 0 : index
    %52 = vector.load %arg4[%51, %c0_17, %c0_18] : memref<1x2x256xf32, #tpu.memory_space<vmem>>, vector<1x2x256xf32>
    %53 = vector.shape_cast %52 : vector<1x2x256xf32> to vector<2x256xf32>
    %54 = vector.shape_cast %50 : vector<2x256xf32> to vector<1x2x256xf32>
    tpu.vector_store %arg4[%51, %c0_17, %c0_18], %54 {strides = array<i32>} : memref<1x2x256xf32, #tpu.memory_space<vmem>>, vector<1x2x256xf32>,
    %c1_i32 = arith.constant 1 : i32
    %c0_19 = arith.constant 0 : index
    %c0_20 = arith.constant 0 : index
    %55 = vector.load %arg5[%c0_19, %c0_20] : memref<2x128xf32, #tpu.memory_space<vmem>>, vector<2x64xf32>
    tpu.vector_store %arg5[%c0_19, %c0_20], %29 {strides = array<i32>} : memref<2x128xf32, #tpu.memory_space<vmem>>, vector<2x64xf32>,
    %c0_21 = arith.constant 0 : index
    %c64_22 = arith.constant 64 : index
    %56 = vector.load %arg5[%c0_21, %c64_22] : memref<2x128xf32, #tpu.memory_space<vmem>>, vector<2x64xf32>
    tpu.vector_store %arg5[%c0_21, %c64_22], %27 {strides = array<i32>} : memref<2x128xf32, #tpu.memory_space<vmem>>, vector<2x64xf32>,
    return
  }
  func.func @transform_0(%arg0: i32) -> (i32, i32, i32) {
    %c0_i32 = arith.constant 0 : i32
    %c0_i32_0 = arith.constant 0 : i32
    %c0_i32_1 = arith.constant 0 : i32
    return %c0_i32, %arg0, %c0_i32_0 : i32, i32, i32
  }
  func.func @transform_1(%arg0: i32) -> (i32, i32) {
    %c0_i32 = arith.constant 0 : i32
    %c0_i32_0 = arith.constant 0 : i32
    %c0_i32_1 = arith.constant 0 : i32
    return %c0_i32, %c0_i32_0 : i32, i32
  }
  func.func @transform_2(%arg0: i32) -> (i32, i32) {
    %c0_i32 = arith.constant 0 : i32
    %c0_i32_0 = arith.constant 0 : i32
    return %arg0, %c0_i32 : i32, i32
  }
  func.func @transform_3(%arg0: i32) -> (i32, i32, i32) {
    %c0_i32 = arith.constant 0 : i32
    %c0_i32_0 = arith.constant 0 : i32
    %c0_i32_1 = arith.constant 0 : i32
    return %c0_i32, %arg0, %c0_i32_0 : i32, i32, i32
  }
  func.func @transform_4(%arg0: i32) -> (i32, i32) {
    %c0_i32 = arith.constant 0 : i32
    %c0_i32_0 = arith.constant 0 : i32
    return %arg0, %c0_i32 : i32, i32
  }
}

</mosaic_0001>

<bundles_post_ra>
// kernel: lstmnet_forward.1
= control target key start
LH: loop header
LB: loop body
LE: loop exit
PB: predicated region body
PF: predicated region fallthrough
CT: control target
= control target key end

     0   :  { %10 = vsyncpa [#allocation3], 0  ;;  %s472_s15 = smov [#allocation2]   ;;  %s525_s0 = inlined_call_operand.vmem [shape: bf16[1,2,16], index: 0, kind: input, shape index: {}]   ;;  %s526_s1 = inlined_call_operand.hbm [shape: bf16[160,256], index: 1, kind: input, shape index: {}]   ;;  %s527_s2 = inlined_call_operand.vmem [shape: f32[2,128], index: 2, kind: input, shape index: {}, may-alias: {2,4}]   ;;  %s528_s3 = inlined_call_operand.vmem [shape: f32[1,2,256], index: 3, kind: output, shape index: {0}]   ;;  %s529_s4 = inlined_call_operand.vmem [shape: f32[2,128], index: 4, kind: output, shape index: {1}, may-alias: {2,4}]  }
   0x1   :  { %s18_s16 = sshll.u32 %s472_s15, 4  ;;  %s19_s16 = int_to_ptr.vmem [resolvable:$true] %s18_s16 }
   0x2   :  { %s458_s17 = scalar_lea.vmem %s19_s16, 2560  ;;  %p463_p1 = scmp.lt.s32.totalorder %s19_s16, %s19_s16 }
   0x3   :  { %p459_p0 = scmp.ne.s32.totalorder %s19_s16, %s458_s17  ;;  %p464_p2 = scmp.lt.s32.totalorder %s458_s17, %s458_s17 }
   0x5   :  { %p465_p3 = por %p464_p2, %p463_p1 }
   0x7   :  { %p466_p4 = pnand %p465_p3, %p459_p0 }
   0x9   :  { %469 = shalt.err (!%p466_p4)
}
   0xa   :  { %s473_s18 = smov 128   ;;  %s474_s19 = smov 8  }
   0xb   :  { %24 = dma.hbm_to_vmem [thread:$0]  %s526_s1, 2560, %s19_s16, [#allocation3], %s473_s18, %s473_s18, %s474_s19  }
   0xc   :  { %470 = dma.done.wait [#allocation3], 2560  }
   0xd   :  { %471 = vsyncadd [#allocation3], 4294964736  ;;  %v475_v0 = vmov 0   ;;  %v401_v1 = vld [vmem:[#allocation2 + $0x44] ss:$8 sps:$4 sm:$0xff]   ;;  %vm150_vm0 = vcmask 130048   ;;  %v226_v50 = vlaneseq }
   0xe   :  { %186 = vmatprep.mubr.bf16.mxu1 %v475_v0  ;;  %131 = vmatprep.mubr.bf16.mxu0 %v475_v0  ;;  %v403_v2 = vld [vmem:[#allocation2 + $0x40] ss:$8 sps:$4 sm:$0xff]   ;;  %v404_v3 = vld [vmem:[#allocation2 + $0x34] ss:$8 sps:$4 sm:$0xff]   ;;  %v406_v4 = vld [vmem:[#allocation2 + $0x30] ss:$8 sps:$4 sm:$0xff]  }
   0xf   :  { %107 = vmatprep.subr.bf16.mxu0 %v401_v1  ;;  %v407_v5 = vld [vmem:[#allocation2 + $0x4] ss:$8 sps:$4 sm:$0xff]   ;;  %v409_v6 = vld [vmem:[#allocation2] ss:$8 sps:$4 sm:$0xff]   ;;  %v413_v10 = vld [vmem:[#allocation2 + $0x14] ss:$8 sps:$4 sm:$0xff]  }
  0x10   :  { %108 = vmatpush1.bf16.msra.mxu0 %v403_v2  ;;  %v410_v7 = vld [vmem:[#allocation2 + $0x24] ss:$8 sps:$4 sm:$0xff]   ;;  %168 = vmatprep.subr.bf16.mxu1 %v407_v5  ;;  %v412_v8 = vld [vmem:[#allocation2 + $0x20] ss:$8 sps:$4 sm:$0xff]   ;;  %v415_v11 = vld [vmem:[#allocation2 + $0x10] ss:$8 sps:$4 sm:$0xff]  }
  0x11   :  { %109 = vmatprep.subr.bf16.mxu0 %v404_v3  ;;  %169 = vmatpush1.bf16.msra.mxu1 %v409_v6  ;;  %v53_v9 = vld [vmem:[%s525_s0] sm:$0x1]  ;;  %vm95_vm1 = vcmask 523264   ;;  %s476_s0 = smov 64   ;;  %v418_v32 = vld [vmem:[#allocation2 + $0x84] ss:$8 sps:$4 sm:$0xff]  }
  0x12   :  { %v52_v12 = vld [vmem:[%s527_s2] sm:$0x3]  ;;  %v421_v33 = vld [vmem:[#allocation2 + $0x74] ss:$8 sps:$4 sm:$0xff]   ;;  %285 = vmatprep.subr.bf16.mxu1 %v418_v32  ;;  %v419_v34 = vld [vmem:[#allocation2 + $0x70] ss:$8 sps:$4 sm:$0xff]  }
  0x13   :  { %v54_v13 = vpack.c.bf16 %v52_v12, %v52_v12  ;;  %v416_v31 = vld [vmem:[#allocation2 + $0x80] ss:$8 sps:$4 sm:$0xff]   ;;  %v424_v35 = vld [vmem:[#allocation2 + $0x64] ss:$8 sps:$4 sm:$0xff]   ;;  %v427_v40 = vld [vmem:[#allocation2 + $0x54] ss:$8 sps:$4 sm:$0xff]  }
  0x14   :  { %110 = vmatpush1.bf16.msra.mxu0 %v406_v4  ;;  %383 = vmatmul.mubr.msk.bf16.vlgmr.msra.gmra.mxu1 %vm150_vm0, %v53_v9  ;;  %v422_v36 = vld [vmem:[#allocation2 + $0x60] ss:$8 sps:$4 sm:$0xff]   ;;  %v425_v41 = vld [vmem:[#allocation2 + $0x50] ss:$8 sps:$4 sm:$0xff]   ;;  %vm359_vm2 = vcmask 517120   ;;  %vm361_vm3 = vcmask 1041920  }
  0x15   :  { %111 = vmatprep.subr.bf16.mxu0 %v410_v7  ;;  %309 = vmatprep.mubr.bf16.mxu1 %v475_v0  ;;  %v227_v51 = vshrl.u32 %v226_v50, 7  ;;  %v49_v52 = vld [vmem:[#allocation2 + $0x90] sm:$0x11]  ;;  %vm338_vm4 = vcmask 1041408  }
  0x16   :  { %286 = vmatpush1.bf16.msra.mxu1 %v416_v31  ;;  %v50_v53 = vunpack.c.l.bf16 %v49_v52  ;;  %v51_v55 = vunpack.c.h.bf16 %v49_v52 }
  0x17   :  { %287 = vmatprep.subr.bf16.mxu1 %v421_v33  ;;  %v228_v54 = vsub.s32 0, %v227_v51 }
  0x18   :  { %112 = vmatpush1.bf16.msra.mxu0 %v412_v8 }
  0x19   :  { %113 = vmatprep.subr.bf16.mxu0 %v413_v10  ;;  %v229_v56 = vrot.slane %v50_v53, %v228_v54  ;;  %v233_v57 = vrot.slane %v51_v55, %v228_v54 }
  0x1a   :  { %288 = vmatpush1.bf16.msra.mxu1 %v419_v34 }
  0x1b   :  { %289 = vmatprep.subr.bf16.mxu1 %v424_v35 }
  0x1c   :  { %114 = vmatpush1.bf16.msra.mxu0 %v415_v11 }
  0x1e   :  { %290 = vmatpush1.bf16.msra.mxu1 %v422_v36 }
  0x1f   :  { %380 = vmatmul.mubr.msk.bf16.vlgmr.msra.gmra.mxu0 %vm95_vm1, %v54_v13  ;;  %291 = vmatprep.subr.bf16.mxu1 %v427_v40 }
  0x22   :  { %292 = vmatpush1.bf16.msra.mxu1 %v425_v41 }
  0xd4   :  { %v188_v14 = vpop.f32.mrf.mxu1 }
  0xd6   :  { %v190_v15 = vpop.f32.mrf.mxu1 }
  0xd8   :  { %v192_v16 = vpop.f32.mrf.mxu1 }
  0xda   :  { %v193_v17 = vpop.f32.mrf.mxu1 }
  0xdf   :  { %v133_v18 = vpop.f32.mrf.mxu0 }
  0xe0   :  { %v189_v19 = vadd.f32 %v188_v14, %v133_v18 }
  0xe1   :  { %v135_v20 = vpop.f32.mrf.mxu0 }
  0xe2   :  { %v191_v21 = vadd.f32 %v190_v15, %v135_v20  ;;  %v384_v25 = vmul.f32 -1.442695, %v189_v19 }
  0xe3   :  { %v137_v22 = vpop.f32.mrf.mxu0 }
  0xe4   :  { %428 = vtanh.f32 %v191_v21  ;;  %v385_v43 = vmul.f32 -1.442695, %v191_v21 }
  0xe5   :  { %v138_v23 = vpop.f32.mrf.mxu0  ;;  %430 = vpow2.f32 %v384_v25 }
  0xf1   :  { %v429_v24 = vpop.eup %428 }
  0xf2   :  { %210 = vrot.lane.b32.xlu0 %v429_v24, %s476_s0  ;;  %v431_v26 = vpop.eup %430 }
  0xf3   :  { %v201_v27 = vadd.f32 1.0, %v431_v26 }
  0xf5   :  { %432 = vrcp.f32 %v201_v27 }
 0x102   :  { %v433_v28 = vpop.eup %432 }
 0x103   :  { %v208_v37 = vmul.f32 %v433_v28, %v52_v12 }
 0x164   :  { %v211_v29 = vpop.permute.xlu0 %210 }
 0x165   :  { %v213_v30 = vmul.f32 %v433_v28, %v211_v29 }
 0x167   :  { %215 = vrot.lane.b32.xlu0 %v213_v30, %s476_s0 }
 0x1d9   :  { %v216_v38 = vpop.permute.xlu0 %215 }
 0x1da   :  { %v218_v39 = vadd.f32 %v216_v38, %v208_v37 }
 0x1dc   :  { %434 = vtanh.f32 %v218_v39 }
 0x1dd   :  { %436 = vpow2.f32 %v385_v43 }
 0x1e9   :  { %v435_v42 = vpop.eup %434 }
 0x1ea   :  { %221 = vrot.lane.b32.xlu1 %v435_v42, %s476_s0  ;;  %v437_v44 = vpop.eup %436 }
 0x1eb   :  { %v202_v45 = vadd.f32 1.0, %v437_v44 }
 0x1ed   :  { %438 = vrcp.f32 %v202_v45 }
 0x1fa   :  { %v439_v46 = vpop.eup %438 }
 0x25c   :  { %v222_v47 = vpop.permute.xlu1 %221 }
 0x25d   :  { %v224_v48 = vmul.f32 %v439_v46, %v222_v47 }
 0x25f   :  { %v225_v49 = vpack.c.bf16 %v224_v48, %v224_v48  ;;  %360 = vst.msk [vmem:[%s529_s4] sm:$0x3] %vm359_vm2, %v224_v48 }
 0x260   :  { %362 = vst.msk [vmem:[%s529_s4] sm:$0x3] %vm361_vm3, %v218_v39 }
 0x261   :  { %394 = vmatmul.mubr.msk.bf16.vlgmr.msra.gmra.mxu1 %vm95_vm1, %v225_v49 }
 0x321   :  { %v311_v58 = vpop.f32.mrf.mxu1 }
 0x322   :  { %v312_v59 = vadd.f32 %v311_v58, %v229_v56 }
 0x323   :  { %v313_v60 = vpop.f32.mrf.mxu1 }
 0x324   :  { %v320_v61 = vand.u32 2147483647, %v312_v59  ;;  %v314_v62 = vadd.f32 %v313_v60, %v233_v57  ;;  %v318_v11 = vmax.f32 %v312_v59, 0.0 }
 0x325   :  { %v315_v63 = vpop.f32.mrf.mxu1 }
 0x326   :  { %v322_v0 = vsub.f32 0.0, %v320_v61  ;;  %v321_v1 = vand.u32 2147483647, %v314_v62  ;;  %v319_v15 = vmax.f32 %v314_v62, 0.0 }
 0x327   :  { %v316_v2 = vpop.f32.mrf.mxu1 }
 0x328   :  { %v324_v3 = vmul.f32 1.442695, %v322_v0  ;;  %v323_v4 = vsub.f32 0.0, %v321_v1 }
 0x32a   :  { %440 = vpow2.f32 %v324_v3  ;;  %v326_v5 = vmul.f32 1.442695, %v323_v4 }
 0x32c   :  { %442 = vpow2.f32 %v326_v5 }
 0x337   :  { %v441_v6 = vpop.eup %440 }
 0x338   :  { %v328_v7 = vadd.f32 1.0, %v441_v6 }
 0x339   :  { %v443_v8 = vpop.eup %442 }
 0x33a   :  { %444 = vlog2.f32 %v328_v7  ;;  %v329_v9 = vadd.f32 1.0, %v443_v8 }
 0x33c   :  { %446 = vlog2.f32 %v329_v9 }
 0x347   :  { %v445_v10 = vpop.eup %444 }
 0x348   :  { %v331_v12 = vmul.f32 0.6931472, %v445_v10 }
 0x349   :  { %v447_v13 = vpop.eup %446 }
 0x34a   :  { %v334_v14 = vadd.f32 %v331_v12, %v318_v11  ;;  %v333_v16 = vmul.f32 0.6931472, %v447_v13 }
 0x34c   :  { %v335_v17 = vadd.f32 %v333_v16, %v319_v15  ;;  %v336_v18 = vadd.f32 0.1, %v334_v14 }
 0x34e   :  { %v337_v19 = vadd.f32 0.1, %v335_v17  ;;  %v339_v20 = vsel %vm338_vm4, %v336_v18, 0.0 }
 0x350   :  { %v340_v21 = vsel %vm338_vm4, %v337_v19, 0.0 }
 0x351   :  { %v341_v22 = vadd.f32 %v340_v21, %v339_v20 }
 0x353   :  { %342 = vadd.xlane.f32.xlu1 %v341_v22 }
 0x3dc   :  { %v343_v23 = vpop.xlane.xlu1 %342 }
 0x3dd   :  { %448 = vrcp.f32 %v343_v23 }
 0x3ea   :  { %v449_v24 = vpop.eup %448 }
 0x3eb   :  { %v345_v25 = vmul.f32 %v449_v24, %v336_v18  ;;  %v346_v26 = vmul.f32 %v449_v24, %v337_v19 }
 0x3ed   :  { %v349_v27 = vcombine.low %v345_v25, %v346_v26 }
 0x3ef   :  { %395 = vst.sshfl [vmem:[%s528_s3] sm:$0x33 pattern:$0x76325410] %v349_v27 }
 0x3f0   :  { %371 = vsyncpa [#allocation3], 1 }

</bundles_post_ra>
